<compile_context>
chip_gen: v7x
topology: tpu7x:2x2x1
jax: 0.10.0
libtpu: 0.0.40
codegen_flags: <defaults>
</compile_context>

<pallas_src>
import jax
import jax.numpy as jnp
from jax.experimental import pallas as pl
from jax.experimental.pallas import tpu as pltpu

D_IN, H1, H2, D_OUT = 7, 32, 16, 4


def _round_up(n, m):
    return ((n + m - 1) // m) * m


def _choose_tile(batch, tb_max):
    """Lane-axis batch tile (multiple of 128).

    As large as possible to amortize the ~0.35us/step pipeline overhead, but
    keep >=2 roughly-equal grid steps when the batch allows it so the single
    'parallel' axis can shard across v7x's two TensorCores.  For batches larger
    than one max tile, balance the tiles so the padded tail stays < 128.
    """
    tb_max = max(128, _round_up(tb_max, 128))
    b_aligned = _round_up(max(batch, 1), 128)
    if b_aligned <= 256:
        return b_aligned                                   # tiny: one tile
    if b_aligned <= tb_max:
        return _round_up((b_aligned + 1) // 2, 128)        # 2 balanced tiles
    steps = (b_aligned + tb_max - 1) // tb_max
    return _round_up((b_aligned + steps - 1) // steps, 128)  # balanced tiles


def _mlp_kernel(x_ref, w1b_ref, w2_ref, b2_ref, w3_ref, b3_ref, o_ref):
    # Feature-major (lane-dense) layout: batch on the lane axis.
    #   x_ref : (8, tb)   rows 0..6 = features, row 7 = ones (folds bias 1)
    #   w1b   : (32, 8)   [W1^T | b1]
    #   w2    : (16, 32)  W2^T        b2 : (16, 1)
    #   w3    : ( 4, 16)  W3^T        b3 : ( 4, 1)
    #   o_ref : ( 4, tb)
    x_t = x_ref[...]

    h1 = jnp.dot(w1b_ref[...], x_t, preferred_element_type=jnp.float32)   # (32, tb)
    h1 = jnp.maximum(h1, 0.0)

    h2 = jnp.dot(w2_ref[...], h1.astype(w2_ref.dtype),
                 preferred_element_type=jnp.float32)                      # (16, tb)
    h2 = jnp.maximum(h2 + b2_ref[...], 0.0)

    h3 = jnp.dot(w3_ref[...], h2.astype(w3_ref.dtype),
                 preferred_element_type=jnp.float32)                      # (4, tb)
    h3 = jnp.maximum(h3 + b3_ref[...], 0.0)

    o_ref[...] = h3.astype(o_ref.dtype)


def encoder_forward(x, params, *, tb_max=16384):
    """x: (B, 7) -> (B, 4). Any B accepted."""
    w1, b1, w2, b2, w3, b3 = params
    B, d_in = x.shape
    assert d_in == D_IN
    dt = x.dtype

    # Feature-major weights; streamed in x.dtype so bf16 inputs feed the MXU
    # natively.  Biases 2/3 stay f32 (epilogue is f32); bias 1 rides in w1b.
    w1b = jnp.concatenate([w1.T, jnp.reshape(b1, (H1, 1))], axis=1).astype(dt)  # (32, 8)
    w2t = w2.T.astype(dt)                                                       # (16, 32)
    w3t = w3.T.astype(dt)                                                       # (4, 16)
    b2c = jnp.reshape(b2, (H2, 1)).astype(jnp.float32)                          # (16, 1)
    b3c = jnp.reshape(b3, (D_OUT, 1)).astype(jnp.float32)                       # (4, 1)

    tb_eff = _choose_tile(B, int(tb_max))
    num_tiles = pl.cdiv(B, tb_eff)
    b_pad = num_tiles * tb_eff

    # Lane-dense feature-major input (8, b_pad): single fused relayout pass.
    # Row 7 is ones (folds bias 1); padded batch columns carry garbage that is
    # sliced off below.
    x_t = jnp.concatenate([x, jnp.ones((B, 1), dt)], axis=1).T                  # (8, B)
    if b_pad > B:
        x_t = jnp.pad(x_t, ((0, 0), (0, b_pad - B)))

    full = lambda i: (0, 0)
    itemsize = jnp.dtype(dt).itemsize
    flops = 2 * B * (D_IN * H1 + H1 * H2 + H2 * D_OUT)
    bytes_accessed = (B * D_IN + B * D_OUT) * itemsize \
        + (w1b.size + w2t.size + w3t.size) * itemsize + (b2c.size + b3c.size) * 4

    out_t = pl.pallas_call(
        _mlp_kernel,
        out_shape=jax.ShapeDtypeStruct((D_OUT, b_pad), dt),
        grid_spec=pltpu.PrefetchScalarGridSpec(
            num_scalar_prefetch=0,
            grid=(num_tiles,),
            in_specs=[
                pl.BlockSpec((D_IN + 1, tb_eff), lambda i: (0, i)),   # x tile (8, tb)
                pl.BlockSpec((H1, D_IN + 1), full),                   # [W1^T | b1]
                pl.BlockSpec((H2, H1), full),                         # W2^T
                pl.BlockSpec((H2, 1), full),                          # b2
                pl.BlockSpec((D_OUT, H2), full),                      # W3^T
                pl.BlockSpec((D_OUT, 1), full),                       # b3
            ],
            out_specs=pl.BlockSpec((D_OUT, tb_eff), lambda i: (0, i)),
        ),
        compiler_params=pltpu.CompilerParams(
            dimension_semantics=("parallel",),
        ),
        cost_estimate=pl.CostEstimate(
            flops=flops, transcendentals=0, bytes_accessed=bytes_accessed),
    )(x_t, w1b, w2t, b2c, w3t, b3c)

    return out_t[:, :B].T                                             # (B, 4)


def init_params(key):
    """PyTorch-Linear-style init (uniform +-1/sqrt(fan_in)); weights (in, out)."""
    dims = [(D_IN, H1), (H1, H2), (H2, D_OUT)]
    params = []
    for fan_in, fan_out in dims:
        key, kw, kb = jax.random.split(key, 3)
        bound = 1.0 / jnp.sqrt(fan_in)
        w = jax.random.uniform(kw, (fan_in, fan_out), jnp.float32, -bound, bound)
        b = jax.random.uniform(kb, (1, fan_out), jnp.float32, -bound, bound)
        params += [w, b]
    return tuple(params)


def encoder_ref(x, params):
    w1, b1, w2, b2, w3, b3 = params
    h = jnp.maximum(x @ w1 + b1, 0.0)
    h = jnp.maximum(h @ w2 + b2, 0.0)
    h = jnp.maximum(h @ w3 + b3, 0.0)
    return h


if __name__ == "__main__":
    key = jax.random.PRNGKey(0)
    kx, kp = jax.random.split(key)

    B = 1000   # not a multiple of 128/tile -> exercises the padded-tail path
    x = jax.random.normal(kx, (B, D_IN), jnp.float32)
    params = init_params(kp)

    out = encoder_forward(x, params)   # tile = 512 lanes -> 2 "parallel" steps
    out = jax.block_until_ready(out)

    ref = encoder_ref(x, params)
    assert out.shape == (B, D_OUT)
    assert jnp.allclose(out, ref, atol=1e-4, rtol=1e-4), float(jnp.max(jnp.abs(out - ref)))

    print("KERNEL_OK")
</pallas_src>

<mosaic_0001>
module attributes {stable_mosaic.version = 11 : i64} {
  func.func @_mlp_kernel(%arg0: i32, %arg1: memref<8x512xf32, #tpu.memory_space<vmem>>, %arg2: memref<32x8xf32, #tpu.memory_space<vmem>>, %arg3: memref<16x32xf32, #tpu.memory_space<vmem>>, %arg4: memref<16x1xf32, #tpu.memory_space<vmem>>, %arg5: memref<4x16xf32, #tpu.memory_space<vmem>>, %arg6: memref<4x1xf32, #tpu.memory_space<vmem>>, %arg7: memref<4x512xf32, #tpu.memory_space<vmem>>) attributes {dimension_semantics = [#tpu.dimension_semantics<parallel>], iteration_bounds = array<i64: 2>, scalar_prefetch = 0 : i64, scratch_operands = 0 : i64, tpu.core_type = #tpu.core_type<tc>, window_params = [{transform_indices = @transform_0, window_bounds = array<i64: 8, 512>}, {pipeline_mode = #tpu.pipeline_mode<synchronous>, transform_indices = @transform_1, window_bounds = array<i64: 32, 8>}, {pipeline_mode = #tpu.pipeline_mode<synchronous>, transform_indices = @transform_2, window_bounds = array<i64: 16, 32>}, {pipeline_mode = #tpu.pipeline_mode<synchronous>, transform_indices = @transform_3, window_bounds = array<i64: 16, 1>}, {pipeline_mode = #tpu.pipeline_mode<synchronous>, transform_indices = @transform_4, window_bounds = array<i64: 4, 16>}, {pipeline_mode = #tpu.pipeline_mode<synchronous>, transform_indices = @transform_5, window_bounds = array<i64: 4, 1>}, {transform_indices = @transform_6, window_bounds = array<i64: 4, 512>}]} {
    %c0 = arith.constant 0 : index
    %c0_0 = arith.constant 0 : index
    %0 = vector.load %arg1[%c0, %c0_0] : memref<8x512xf32, #tpu.memory_space<vmem>>, vector<8x512xf32>
    %c0_1 = arith.constant 0 : index
    %c0_2 = arith.constant 0 : index
    %1 = vector.load %arg2[%c0_1, %c0_2] : memref<32x8xf32, #tpu.memory_space<vmem>>, vector<32x8xf32>
    %cst = arith.constant dense<0.000000e+00> : vector<32x512xf32>
    %2 = tpu.matmul %1, %0, %cst {dimension_numbers = #tpu.dot_dimension_numbers<[1], [0], [0], [1], [0, 0, 1, 1], [], []>} : vector<32x8xf32>, vector<8x512xf32>, vector<32x512xf32> -> vector<32x512xf32>
    %cst_3 = arith.constant 0.000000e+00 : f32
    %3 = vector.broadcast %cst_3 : f32 to vector<32x512xf32>
    %4 = arith.maximumf %2, %3 : vector<32x512xf32>
    %c0_4 = arith.constant 0 : index
    %c0_5 = arith.constant 0 : index
    %5 = vector.load %arg3[%c0_4, %c0_5] : memref<16x32xf32, #tpu.memory_space<vmem>>, vector<16x32xf32>
    %cst_6 = arith.constant dense<0.000000e+00> : vector<16x512xf32>
    %6 = tpu.matmul %5, %4, %cst_6 {dimension_numbers = #tpu.dot_dimension_numbers<[1], [0], [0], [1], [0, 0, 1, 1], [], []>} : vector<16x32xf32>, vector<32x512xf32>, vector<16x512xf32> -> vector<16x512xf32>
    %c0_7 = arith.constant 0 : index
    %c0_8 = arith.constant 0 : index
    %7 = vector.load %arg4[%c0_7, %c0_8] : memref<16x1xf32, #tpu.memory_space<vmem>>, vector<16x1xf32>
    %8 = vector.broadcast %7 : vector<16x1xf32> to vector<16x512xf32>
    %9 = arith.addf %6, %8 : vector<16x512xf32>
    %cst_9 = arith.constant 0.000000e+00 : f32
    %10 = vector.broadcast %cst_9 : f32 to vector<16x512xf32>
    %11 = arith.maximumf %9, %10 : vector<16x512xf32>
    %c0_10 = arith.constant 0 : index
    %c0_11 = arith.constant 0 : index
    %12 = vector.load %arg5[%c0_10, %c0_11] : memref<4x16xf32, #tpu.memory_space<vmem>>, vector<4x16xf32>
    %cst_12 = arith.constant dense<0.000000e+00> : vector<4x512xf32>
    %13 = tpu.matmul %12, %11, %cst_12 {dimension_numbers = #tpu.dot_dimension_numbers<[1], [0], [0], [1], [0, 0, 1, 1], [], []>} : vector<4x16xf32>, vector<16x512xf32>, vector<4x512xf32> -> vector<4x512xf32>
    %c0_13 = arith.constant 0 : index
    %c0_14 = arith.constant 0 : index
    %14 = vector.load %arg6[%c0_13, %c0_14] : memref<4x1xf32, #tpu.memory_space<vmem>>, vector<4x1xf32>
    %15 = vector.broadcast %14 : vector<4x1xf32> to vector<4x512xf32>
    %16 = arith.addf %13, %15 : vector<4x512xf32>
    %cst_15 = arith.constant 0.000000e+00 : f32
    %17 = vector.broadcast %cst_15 : f32 to vector<4x512xf32>
    %18 = arith.maximumf %16, %17 : vector<4x512xf32>
    %c0_16 = arith.constant 0 : index
    %c0_17 = arith.constant 0 : index
    %19 = vector.load %arg7[%c0_16, %c0_17] : memref<4x512xf32, #tpu.memory_space<vmem>>, vector<4x512xf32>
    tpu.vector_store %arg7[%c0_16, %c0_17], %18 {strides = array<i32>} : memref<4x512xf32, #tpu.memory_space<vmem>>, vector<4x512xf32>,
    return
  }
  func.func @transform_0(%arg0: i32) -> (i32, i32) {
    %c0_i32 = arith.constant 0 : i32
    %c0_i32_0 = arith.constant 0 : i32
    return %c0_i32, %arg0 : i32, i32
  }
  func.func @transform_1(%arg0: i32) -> (i32, i32) {
    %c0_i32 = arith.constant 0 : i32
    %c0_i32_0 = arith.constant 0 : i32
    %c0_i32_1 = arith.constant 0 : i32
    return %c0_i32, %c0_i32_0 : i32, i32
  }
  func.func @transform_2(%arg0: i32) -> (i32, i32) {
    %c0_i32 = arith.constant 0 : i32
    %c0_i32_0 = arith.constant 0 : i32
    %c0_i32_1 = arith.constant 0 : i32
    return %c0_i32, %c0_i32_0 : i32, i32
  }
  func.func @transform_3(%arg0: i32) -> (i32, i32) {
    %c0_i32 = arith.constant 0 : i32
    %c0_i32_0 = arith.constant 0 : i32
    %c0_i32_1 = arith.constant 0 : i32
    return %c0_i32, %c0_i32_0 : i32, i32
  }
  func.func @transform_4(%arg0: i32) -> (i32, i32) {
    %c0_i32 = arith.constant 0 : i32
    %c0_i32_0 = arith.constant 0 : i32
    %c0_i32_1 = arith.constant 0 : i32
    return %c0_i32, %c0_i32_0 : i32, i32
  }
  func.func @transform_5(%arg0: i32) -> (i32, i32) {
    %c0_i32 = arith.constant 0 : i32
    %c0_i32_0 = arith.constant 0 : i32
    %c0_i32_1 = arith.constant 0 : i32
    return %c0_i32, %c0_i32_0 : i32, i32
  }
  func.func @transform_6(%arg0: i32) -> (i32, i32) {
    %c0_i32 = arith.constant 0 : i32
    %c0_i32_0 = arith.constant 0 : i32
    return %c0_i32, %arg0 : i32, i32
  }
}

</mosaic_0001>

<bundles_post_ra>
// kernel: tpu_custom_call.1
= control target key start
LH: loop header
LB: loop body
LE: loop exit
PB: predicated region body
PF: predicated region fallthrough
CT: control target
= control target key end

     0   :  { %11 = vsyncpa [#allocation3], 0  ;;  %s1375_s0 = inlined_call_operand.hbm [shape: f32[8,1024], index: 0, kind: input, shape index: {}]   ;;  %s1376_s1 = inlined_call_operand.vmem [shape: f32[32,8], index: 1, kind: input, shape index: {}]   ;;  %s1377_s2 = inlined_call_operand.vmem [shape: f32[16,32], index: 2, kind: input, shape index: {}]   ;;  %s1378_s3 = inlined_call_operand.vmem [shape: f32[16,1], index: 3, kind: input, shape index: {}]   ;;  %s1379_s4 = inlined_call_operand.vmem [shape: f32[4,16], index: 4, kind: input, shape index: {}]   ;;  %s1380_s5 = inlined_call_operand.vmem [shape: f32[4,1], index: 5, kind: input, shape index: {}]   ;;  %s1381_s6 = inlined_call_operand.hbm [shape: f32[4,1024], index: 6, kind: output, shape index: {}]  }
   0x1   :  { %13 = vsyncpa [#allocation3 + $0x1], 0 }
   0x2   :  { %14 = vsyncpa [#allocation4], 0 }
   0x3   :  { %16 = vsyncpa [#allocation4 + $0x1], 0  ;;  %s1161_s21 = smov 0   ;;  %s1163_s22 = smov 0  }
   0x4   :  { %s1165_s23 = smov 0   ;;  %s1167_s24 = smov 0  }
   0x5 LB: > { %s1182_s25 = sadd.s32 4294967295, %s1120_s24   ;;  %s920_s26 = sadd.s32 4294967294, %s1120_s24   ;;  %s1120_s24 = sphi %s1167_s24, %s1396_s24   ;;  %s1116_s23 = sphi %s1165_s23, %s1395_s23   ;;  %s1112_s22 = sphi %s1163_s22, %s1394_s22   ;;  %s1108_s21 = sphi %s1161_s21, %s1393_s21  }
   0x6   : > { %s1186_s27 = sadd.s32 1, %s1120_s24   ;;  %s29_s28 = sadd.s32 1, %s1116_s23 }
   0x7   : > { %s26_s29 = ssub.s32 %s1120_s24, %s1186_s27  ;;  %p36_p0 = scmp.ne.s32.totalorder %s1116_s23, %s1112_s22 }
   0x8   : > { %p27_p1 = scmp.eq.s32.totalorder %s26_s29, 0  ;;  %p37_p2 = scmp.eq.s32.totalorder %s1120_s24, 0 }
   0x9   : > { %p42_p3 = scmp.ne.s32.totalorder %s1112_s22, %s1108_s21  ;;  %p43_p4 = scmp.eq.s32.totalorder %s1182_s25, 0 }
   0xa   : > { %s1198_s30 = scalar_select %p27_p1, %s1116_s23, %s29_s28  }
   0xb   : > { %p1200_p5 = por %p37_p2, %p36_p0  ;;  %p1204_p6 = por %p43_p4, %p42_p3 }
   0xc   : > { %p171_p7 = scmp.eq.s32.totalorder %s1182_s25, 1  ;;  %p177_p8 = scmp.eq.s32.totalorder %s920_s26, 1 }
   0xd   : > { %p986_p10 = scmp.lt.s32.totalorder %s1120_s24, 2  ;;  %s212_s11 = sand.u32 1, %s1116_s23  }
   0xe   : > { %p1211_p11 = por %p171_p7, %p36_p0  ;;  %p1215_p12 = por %p177_p8, %p42_p3 }
   0xf   : > { %s948_s12 = sshll.u32 %s1120_s24, 9  ;;  %s923_s13 = sshll.u32 %s212_s11, 5 }
  0x10   : > { %s1385_s9 = scalar_select %p1211_p11, 1, 0 }
  0x11   : > { %s1386_s10 = scalar_select %p1215_p12, 1, 0 }
  0x12   : > { %s1224_s16 = scalar_lea.hbm %s1375_s0, %s948_s12  ;;  %s216_s17 = scalar_lea.vmem [#allocation2], %s923_s13 }
  0x13   : > { %s224_s18 = sshll.u32 %s216_s17, 4  ;;  %p1228_p13 = pnand %p986_p10, %p1200_p5  ;;  %s1232_s18 = int_to_ptr.vmem [resolvable:$true] %s224_s18 }
  0x14   : > { %s213_s20 = scalar_lea.sflag [#allocation3], %s212_s11  ;;  %s1024_s26 = scalar_lea.hbm %s1224_s16, 512 }
  0x15   : > { %p1025_p2 = scmp.ne.s32.totalorder %s1224_s16, %s1024_s26  ;;  %p1026_p3 = pneg %p1228_p13 }
  0x16   : > { %s1029_s7 = scalar_lea.hbm %s1375_s0, 1024  ;;  %p1030_p5 = scmp.lt.u32.totalorder %s1224_s16, %s1375_s0 }
  0x17   : > { %p1027_p4 = pnand %p1026_p3, %p1025_p2  ;;  %p1031_p8 = scmp.lt.u32.totalorder %s1029_s7, %s1024_s26 }
  0x18   : > { %p1033_p9 = scmp.lt.u32.totalorder %s1024_s26, %s1224_s16 }
  0x19   : > { %p1028_p7 = pneg %p1027_p4  ;;  %p1032_p10 = por %p1031_p8, %p1030_p5 }
  0x1b   : > { %p1034_p0 = por %p1033_p9, %p1032_p10 }
  0x1d   : > { %p1035_p1 = pnand %p1034_p0, %p1028_p7 }
  0x1f   : > { %1038 = shalt.err (!%p1035_p1)
}
  0x20   : > { %s1039_s11 = scalar_lea.vmem %s1232_s18, 512  ;;  %s1122_s14 = smov [#allocation2]  }
  0x21   : > { %p1040_p2 = scmp.ne.s32.totalorder %s1232_s18, %s1039_s11  ;;  %s1044_s15 = sshll.u32 %s1122_s14, 4  ;;  %s1045_s15 = int_to_ptr.vmem [resolvable:$false] %s1044_s15 }
  0x22   : > { %s1046_s17 = scalar_lea.vmem %s1045_s15, 1024  ;;  %p1047_p11 = scmp.lt.s32.totalorder %s1232_s18, %s1045_s15 }
  0x23   : > { %p1042_p4 = pnand %p1040_p2, %p1026_p3  ;;  %p1048_p5 = scmp.lt.s32.totalorder %s1046_s17, %s1039_s11 }
  0x25   : > { %p1043_p12 = pneg %p1042_p4  ;;  %p1049_p8 = por %p1048_p5, %p1047_p11 }
  0x27   : > { %p1050_p9 = pnand %p1049_p8, %p1043_p12 }
  0x29   : > { %1053 = shalt.err (!%p1050_p9)
}
  0x2a   : > { %981 = dma.hbm_to_vmem [thread:$0]  (!%p1228_p13), %s1224_s16, 512, %s1232_s18, %s213_s20  }
  0x2b   : > { %p1388_p0 = scmp.lt.s32.totalorder %s1120_s24, 3  ;;  %p1389_p1 = scmp.ge.s32.totalorder %s1120_s24, 1 }
  0x2d   : > { %p230_p3 = pnand %p1389_p1, %p1388_p0 }
  0x2e   : > { %s1266_s26 = sand.u32 (!%p230_p3), 1, %s1112_s22  }
  0x2f   : > { %233 = sbr.rel (%p230_p3) target bundleno = 752 (0x2f0), region = 44  ;;  %s927_s28 = sshll.u32 (!%p230_p3), %s1266_s26, 5 }
  0x30   : > { %s236_s29 = scalar_lea.sflag (!%p230_p3), [#allocation3], %s1266_s26  ;;  %s239_s7 = scalar_lea.vmem (!%p230_p3), [#allocation2], %s927_s28 }
  0x36   : > { %1099 = dma.done.wait (%p1204_p6), %s236_s29, 512  }
  0x37   : > { %1101 = vsyncadd (%p1204_p6), %s236_s29, 4294966784  ;;  %v1123_v0 = vmov 0.0   ;;  %v271_v1 = vld [vmem:[%s239_s7 + $0x8] sm:$0xff]  ;;  %v273_v2 = vld [vmem:[%s239_s7 + $0x18] sm:$0xff]  ;;  %vm278_vm0 = vcmask 64512   ;;  %v1124_v10 = vmov 0  }
  0x38   : > { %355 = vmatprep.mubr.f32.mxu0 %v1123_v0  ;;  %444 = vmatprep.mubr.f32.mxu1 %v1123_v0  ;;  %v270_v3 = vld [vmem:[%s239_s7] sm:$0xff]  ;;  %v272_v4 = vld [vmem:[%s239_s7 + $0x10] sm:$0xff]  ;;  %v275_v6 = vld [vmem:[%s1376_s1 + $0x8] sm:$0xff]  ;;  %vm499_vm1 = vcmask 261120   ;;  %vm675_vm2 = vcmask 130048   ;;  %s928_s13 = sshll.u32 %s1266_s26, 4 }
  0x39   : > { %291 = vmatprep.subr.mxu0 %v271_v1  ;;  %380 = vmatprep.subr.mxu1 %v273_v2  ;;  %v274_v5 = vld [vmem:[%s1376_s1] sm:$0xff]  ;;  %v276_v7 = vld [vmem:[%s1376_s1 + $0x10] sm:$0xff]  ;;  %v277_v8 = vld [vmem:[%s1376_s1 + $0x18] sm:$0xff]  ;;  %s949_s11 = sshll.u32 %s1182_s25, 8  ;;  %s267_s14 = scalar_lea.vmem [#allocation5], %s928_s13 }
  0x3a   : > { %292 = vmatpush1.msra.mxu0 %v270_v3  ;;  %381 = vmatpush1.msra.mxu1 %v272_v4  ;;  %v487_v9 = vld [vmem:[%s1378_s3] sm:$0xff]  ;;  %v488_v11 = vld [vmem:[%s1378_s3 + $0x8] sm:$0xff]  ;;  %s850_s15 = sshll.u32 %s267_s14, 4  ;;  %s1331_s29 = scalar_lea.hbm %s1381_s6, %s949_s11  ;;  %s1333_s15 = int_to_ptr.vmem [resolvable:$true] %s850_s15 }
  0x3b   : > { %929 = vmatmul.mubr.msk.f32.vlgmr.msra.gmra.mrb[0].mxu0 %vm278_vm0, %v274_v5  ;;  %933 = vmatmul.mubr.msk.f32.vlgmr.msra.gmra.mrb[0].mxu1 %vm278_vm0, %v274_v5  ;;  %v485_v52 = vld [vmem:[%s1377_s2] sm:$0xff]  ;;  %v486_v53 = vld [vmem:[%s1377_s2 + $0x8] sm:$0xff]  ;;  %s836_s7 = scalar_lea.sflag [#allocation4], %s1266_s26  ;;  %s1054_s25 = scalar_lea.vmem %s1333_s15, 256 }
  0x3c   : > { %361 = vmatprep.mubr.f32.mxu0 %v1123_v0  ;;  %450 = vmatprep.mubr.f32.mxu1 %v1123_v0  ;;  %v669_v54 = vld [vmem:[%s1380_s5] sm:$0xf]  ;;  %p1055_p6 = scmp.ne.s32.totalorder %s1333_s15, %s1054_s25  ;;  %p1390_p11 = scmp.ne.s32.totalorder %s1385_s9, 0 }
  0x3d   : > { %1022 = vset.pattern.permute.xlu0 %v1124_v10  ;;  %1023 = vset.pattern.permute.xlu1 %v1124_v10  ;;  %s1125_s16 = smov [#allocation5]  }
  0x3e   : > { %491 = vperm.xlu0 %1022, %v487_v9   ;;  %672 = vperm.xlu1 %1023, %v669_v54   ;;  %p1056_p12 = pnand %p1055_p6, %p1390_p11  ;;  %s1058_s18 = sshll.u32 %s1125_s16, 4  ;;  %s1059_s18 = int_to_ptr.vmem [resolvable:$false] %s1058_s18 }
  0x3f   : > { %930 = vmatmul.mubr.msk.f32.gmra.mrb[2].mxu0 %vm278_vm0, %v275_v6  ;;  %934 = vmatmul.mubr.msk.f32.gmra.mrb[2].mxu1 %vm278_vm0, %v275_v6  ;;  %s1060_s8 = scalar_lea.vmem %s1059_s18, 512  ;;  %p1061_p7 = scmp.lt.s32.totalorder %s1333_s15, %s1059_s18 }
  0x40   : > { %367 = vmatprep.mubr.f32.mxu0 %v1123_v0  ;;  %456 = vmatprep.mubr.f32.mxu1 %v1123_v0  ;;  %p1057_p13 = pneg %p1056_p12  ;;  %p1062_p10 = scmp.lt.s32.totalorder %s1060_s8, %s1054_s25 }
  0x42   : > { %496 = vperm.xlu0 %1022, %v488_v11   ;;  %p1063_p2 = por %p1062_p10, %p1061_p7 }
  0x43   : > { %931 = vmatmul.mubr.msk.f32.gmra.mrb[4].mxu0 %vm278_vm0, %v276_v7  ;;  %935 = vmatmul.mubr.msk.f32.gmra.mrb[4].mxu1 %vm278_vm0, %v276_v7 }
  0x44   : > { %373 = vmatprep.mubr.f32.mxu0 %v1123_v0  ;;  %462 = vmatprep.mubr.f32.mxu1 %v1123_v0  ;;  %p1064_p4 = pnand %p1063_p2, %p1057_p13 }
  0x47   : > { %932 = vmatmul.mubr.msk.f32.gmra.mrb[6].mxu0 %vm278_vm0, %v277_v8  ;;  %936 = vmatmul.mubr.msk.f32.gmra.mrb[6].mxu1 %vm278_vm0, %v277_v8 }
  0x48   : > { %570 = vmatprep.mubr.f32.mxu0 %v1123_v0  ;;  %647 = vmatprep.mubr.f32.mxu1 %v1123_v0 }
  0xbd   : > { %v492_v55 = vpop.permute.xlu0 %491 }
  0xc1   : > { %v497_v62 = vpop.permute.xlu0 %496 }
 0x10e   : > { %v357_v12 = vpop.f32.mrb[0].mxu0  ;;  %v446_v13 = vpop.f32.mrb[0].mxu1 }
 0x10f   : > { %v359_v14 = vpop.f32.mrb[1].mxu0  ;;  %v448_v15 = vpop.f32.mrb[1].mxu1  ;;  %v469_v18 = vmax.f32 %v357_v12, 0.0  ;;  %v471_v19 = vmax.f32 %v446_v13, 0.0 }
 0x110   : > { %v470_v24 = vmax.f32 %v359_v14, 0.0  ;;  %v472_v25 = vmax.f32 %v448_v15, 0.0 }
 0x112   : > { %v363_v16 = vpop.f32.mrb[2].mxu0  ;;  %v452_v17 = vpop.f32.mrb[2].mxu1 }
 0x113   : > { %v473_v20 = vmax.f32 %v363_v16, 0.0  ;;  %v475_v21 = vmax.f32 %v452_v17, 0.0  ;;  %v365_v22 = vpop.f32.mrb[3].mxu0  ;;  %v454_v23 = vpop.f32.mrb[3].mxu1 }
 0x114   : > { %v474_v26 = vmax.f32 %v365_v22, 0.0  ;;  %v476_v27 = vmax.f32 %v454_v23, 0.0  ;;  %v673_v22 = vpop.permute.xlu1 %672 }
 0x115   : > { %v952_v28 = vpack.c.bf16 %v473_v20, %v469_v18  ;;  %v960_v29 = vpack.c.bf16 %v475_v21, %v471_v19  ;;  %v668_v21 = vld [vmem:[%s1379_s4] sm:$0xf] }
 0x116   : > { %v950_v30 = vpack.c.bf16 %v474_v26, %v470_v24  ;;  %v958_v31 = vpack.c.bf16 %v476_v27, %v472_v25  ;;  %v369_v32 = vpop.f32.mrb[4].mxu0  ;;  %v458_v33 = vpop.f32.mrb[4].mxu1 }
 0x117   : > { %v371_v34 = vpop.f32.mrb[5].mxu0  ;;  %v460_v35 = vpop.f32.mrb[5].mxu1  ;;  %v477_v38 = vmax.f32 %v369_v32, 0.0  ;;  %v479_v39 = vmax.f32 %v458_v33, 0.0 }
 0x118   : > { %951 = vmatprep.subr.bf16.mxu0 %v950_v30  ;;  %959 = vmatprep.subr.bf16.mxu1 %v958_v31  ;;  %v478_v44 = vmax.f32 %v371_v34, 0.0  ;;  %v480_v45 = vmax.f32 %v460_v35, 0.0 }
 0x119   : > { %953 = vmatpush1.bf16.msra.mxu0 %v952_v28  ;;  %961 = vmatpush1.bf16.msra.mxu1 %v960_v29 }
 0x11a   : > { %v375_v36 = vpop.f32.mrb[6].mxu0  ;;  %v464_v37 = vpop.f32.mrb[6].mxu1 }
 0x11b   : > { %v481_v40 = vmax.f32 %v375_v36, 0.0  ;;  %v483_v41 = vmax.f32 %v464_v37, 0.0  ;;  %v377_v42 = vpop.f32.mrb[7].mxu0  ;;  %v466_v43 = vpop.f32.mrb[7].mxu1 }
 0x11c   : > { %v482_v46 = vmax.f32 %v377_v42, 0.0  ;;  %v484_v47 = vmax.f32 %v466_v43, 0.0 }
 0x11d   : > { %v956_v48 = vpack.c.bf16 %v481_v40, %v477_v38  ;;  %v964_v49 = vpack.c.bf16 %v483_v41, %v479_v39 }
 0x11e   : > { %v954_v50 = vpack.c.bf16 %v482_v46, %v478_v44  ;;  %v962_v51 = vpack.c.bf16 %v484_v47, %v480_v45 }
 0x120   : > { %955 = vmatprep.subr.bf16.mxu0 %v954_v50  ;;  %963 = vmatprep.subr.bf16.mxu1 %v962_v51 }
 0x121   : > { %957 = vmatpush1.bf16.msra.mxu0 %v956_v48  ;;  %965 = vmatpush1.bf16.msra.mxu1 %v964_v49 }
 0x124   : > { %937 = vmatmul.mubr.msk.f32.vlgmr.msra.gmra.mrb[8].mxu0 %vm499_vm1, %v485_v52  ;;  %939 = vmatmul.mubr.msk.f32.vlgmr.msra.gmra.mrb[8].mxu1 %vm499_vm1, %v485_v52 }
 0x125   : > { %576 = vmatprep.mubr.f32.mxu0 %v1123_v0  ;;  %653 = vmatprep.mubr.f32.mxu1 %v1123_v0 }
 0x128   : > { %938 = vmatmul.mubr.msk.f32.gmra.mrb[10].mxu0 %vm499_vm1, %v486_v53  ;;  %940 = vmatmul.mubr.msk.f32.gmra.mrb[10].mxu1 %vm499_vm1, %v486_v53 }
 0x129   : > { %743 = vmatprep.mubr.f32.mxu0 %v1123_v0  ;;  %814 = vmatprep.mubr.f32.mxu1 %v1123_v0 }
 0x1f7   : > { %v572_v56 = vpop.f32.mrb[8].mxu0  ;;  %v649_v57 = vpop.f32.mrb[8].mxu1 }
 0x1f8   : > { %v574_v58 = vpop.f32.mrb[9].mxu0  ;;  %v651_v59 = vpop.f32.mrb[9].mxu1  ;;  %v573_v60 = vadd.f32 %v572_v56, %v492_v55  ;;  %v650_v61 = vadd.f32 %v649_v57, %v492_v55 }
 0x1f9   : > { %v575_v63 = vadd.f32 %v574_v58, %v492_v55  ;;  %v652_v1 = vadd.f32 %v651_v59, %v492_v55 }
 0x1fa   : > { %v660_v9 = vmax.f32 %v573_v60, 0.0  ;;  %v662_v10 = vmax.f32 %v650_v61, 0.0 }
 0x1fb   : > { %v578_v2 = vpop.f32.mrb[10].mxu0  ;;  %v655_v3 = vpop.f32.mrb[10].mxu1  ;;  %v661_v13 = vmax.f32 %v575_v63, 0.0  ;;  %v663_v14 = vmax.f32 %v652_v1, 0.0 }
 0x1fc   : > { %v579_v4 = vadd.f32 %v578_v2, %v497_v62  ;;  %v656_v5 = vadd.f32 %v655_v3, %v497_v62  ;;  %v580_v0 = vpop.f32.mrb[11].mxu0  ;;  %v657_v6 = vpop.f32.mrb[11].mxu1 }
 0x1fd   : > { %v581_v7 = vadd.f32 %v580_v0, %v497_v62  ;;  %v658_v8 = vadd.f32 %v657_v6, %v497_v62 }
 0x1fe   : > { %v664_v11 = vmax.f32 %v579_v4, 0.0  ;;  %v666_v12 = vmax.f32 %v656_v5, 0.0 }
 0x1ff   : > { %v665_v15 = vmax.f32 %v581_v7, 0.0  ;;  %v667_v16 = vmax.f32 %v658_v8, 0.0 }
 0x200   : > { %v968_v17 = vpack.c.bf16 %v664_v11, %v660_v9  ;;  %v972_v18 = vpack.c.bf16 %v666_v12, %v662_v10 }
 0x201   : > { %v966_v19 = vpack.c.bf16 %v665_v15, %v661_v13  ;;  %v970_v20 = vpack.c.bf16 %v667_v16, %v663_v14 }
 0x203   : > { %967 = vmatprep.subr.bf16.mxu0 %v966_v19  ;;  %971 = vmatprep.subr.bf16.mxu1 %v970_v20 }
 0x204   : > { %969 = vmatpush1.bf16.msra.mxu0 %v968_v17  ;;  %973 = vmatpush1.bf16.msra.mxu1 %v972_v18 }
 0x207   : > { %941 = vmatmul.mubr.msk.f32.vlgmr.msra.gmra.mrb[12].mxu0 %vm675_vm2, %v668_v21  ;;  %942 = vmatmul.mubr.msk.f32.vlgmr.msra.gmra.mrb[12].mxu1 %vm675_vm2, %v668_v21 }
 0x2da   : > { %v745_v23 = vpop.f32.mrb[12].mxu0  ;;  %v816_v24 = vpop.f32.mrb[12].mxu1 }
 0x2db   : > { %v746_v25 = vadd.f32 %v745_v23, %v673_v22  ;;  %v817_v26 = vadd.f32 %v816_v24, %v673_v22  ;;  %v747_v27 = vpop.f32.mrb[13].mxu0  ;;  %v818_v28 = vpop.f32.mrb[13].mxu1 }
 0x2dc   : > { %v748_v29 = vadd.f32 %v747_v27, %v673_v22  ;;  %v819_v30 = vadd.f32 %v818_v28, %v673_v22 }
 0x2dd   : > { %v821_v31 = vmax.f32 %v746_v25, 0.0  ;;  %v823_v32 = vmax.f32 %v817_v26, 0.0 }
 0x2de   : > { %v822_v33 = vmax.f32 %v748_v29, 0.0  ;;  %v824_v34 = vmax.f32 %v819_v30, 0.0 }
 0x2e0   : > { %v829_v35 = vcombine.low %v821_v31, %v822_v33  ;;  %v830_v36 = vcombine.low %v823_v32, %v824_v34 }
 0x2e2   : > { %833 = vst [vmem:[%s267_s14] sm:$0xff] %v829_v35  ;;  %834 = vst [vmem:[%s267_s14 + $0x8] sm:$0xff] %v830_v36 }
 0x2e3   : > { %1067 = shalt.err (!%p1064_p4)
}
 0x2e4   : > { %s1068_s26 = scalar_lea.hbm %s1331_s29, 256  ;;  %s1072_s12 = scalar_lea.hbm %s1381_s6, 512 }
 0x2e5   : > { %p1069_p5 = scmp.ne.s32.totalorder %s1331_s29, %s1068_s26  ;;  %p1073_p0 = scmp.lt.u32.totalorder %s1331_s29, %s1381_s6 }
 0x2e6   : > { %p1074_p1 = scmp.lt.u32.totalorder %s1072_s12, %s1068_s26  ;;  %p1076_p6 = scmp.lt.u32.totalorder %s1068_s26, %s1331_s29 }
 0x2e7   : > { %p1070_p8 = pnand %p1069_p5, %p1390_p11 }
 0x2e8   : > { %p1075_p3 = por %p1074_p1, %p1073_p0 }
 0x2e9   : > { %p1071_p9 = pneg %p1070_p8 }
 0x2ea   : > { %p1077_p12 = por %p1076_p6, %p1075_p3 }
 0x2ec   : > { %p1078_p13 = pnand %p1077_p12, %p1071_p9 }
 0x2ee   : > { %1081 = shalt.err (!%p1078_p13)
}
 0x2ef   : > { %976 = dma.vmem_to_hbm [thread:$0]  (%p1390_p11), %s1333_s15, 256, %s1331_s29, %s836_s7  }
 0x2f0 PF: > { %s862_s14 = sand.u32 1, %s1108_s21   ;;  %p1391_p7 = scmp.ne.s32.totalorder %s1386_s10, 0 }
 0x2f1   : > { %p1392_p10 = scmp.ge.s32.totalorder %s1120_s24, 2  ;;  %s863_s17 = scalar_lea.sflag [#allocation4], %s862_s14 }
 0x2f3   : > { %p983_p2 = pnand %p1392_p10, %p1391_p7 }
 0x2f5   : > { %1103 = dma.done.wait (!%p983_p2), %s863_s17, 256  }
 0x2f6   : > { %1105 = vsyncadd (!%p983_p2), %s863_s17, 4294967040  ;;  %p19_p4 = scmp.ge.s32.totalorder %s1186_s27, 4   ;;  %s1393_s21 = smov %s1112_s22 }
 0x2f7   : > { %s1394_s22 = smov %s1116_s23  ;;  %s1395_s23 = smov %s1198_s30 }
 0x2f8   : > { %s1396_s24 = smov %s1186_s27  ;;  %21 = sbr.rel (!%p19_p4) target bundleno = 5 (0x5), region = 89 }
 0x2ff   :  { %868 = vsyncpa [#allocation3], 1 }
 0x300   :  { %870 = vsyncpa [#allocation3 + $0x1], 1 }
 0x301   :  { %871 = vsyncpa [#allocation4], 1 }
 0x302   :  { %873 = vsyncpa [#allocation4 + $0x1], 1 }

</bundles_post_ra>
